<compile_context>
chip_gen: v7x
topology: tpu7x:2x2x1
jax: 0.10.0
libtpu: 0.0.40
codegen_flags: <defaults>
</compile_context>

<pallas_src>
import jax
import jax.numpy as jnp
from jax.experimental import pallas as pl
from jax.experimental.pallas import tpu as pltpu


def _copy_kernel(x_ref, o_ref):
    # Pure lane-dense identity copy: one vld/vst stream, no VPU/XLU work.
    o_ref[...] = x_ref[...]


def _largest_divisor_block(dim, unit, max_block):
    """Largest multiple of `unit` that divides `dim` and is <= max_block.

    Falls back to the full dimension (always legal per the full-extent rule)
    when `dim` is not a multiple of `unit`.
    """
    if dim % unit != 0:
        return dim
    cand = (min(dim, max_block) // unit) * unit
    while cand >= unit:
        if dim % cand == 0:
            return cand
        cand -= unit
    return dim


def flatten_forward(x):
    """Pallas equivalent of flattenlayer.forward: (N, ...) -> (N, prod(...))."""
    n = x.shape[0]
    flat = 1
    for d in x.shape[1:]:
        flat *= d

    # Metadata-only re-view in the wrapper: the kernel sees a lane-dense slab.
    x2d = jnp.reshape(x, (n, flat))

    # Tile sizes: second-to-last dim multiple of 8 (or full N), last dim
    # multiple of 128 (or full flat).  <= 2 MiB per f32 block.
    block_n = _largest_divisor_block(n, 8, 128)
    block_f = _largest_divisor_block(flat, 128, 4096)
    grid = (n // block_n, flat // block_f)

    return pl.pallas_call(
        _copy_kernel,
        out_shape=jax.ShapeDtypeStruct((n, flat), x.dtype),
        grid=grid,
        in_specs=[pl.BlockSpec((block_n, block_f), lambda i, j: (i, j))],
        out_specs=pl.BlockSpec((block_n, block_f), lambda i, j: (i, j)),
        compiler_params=pltpu.CompilerParams(
            dimension_semantics=("parallel", "parallel"),
        ),
    )(x2d)


if __name__ == "__main__":
    key = jax.random.PRNGKey(0)
    # Small NCHW input consistent with a conv-net feature map feeding flatten.
    x = jax.random.normal(key, (2, 4, 16, 16), dtype=jnp.float32)

    flatten_jit = jax.jit(flatten_forward)
    out = flatten_jit(x)
    out = jax.block_until_ready(out)

    # Verify against the reference semantics (torch .view == row-major reshape).
    ref = jnp.reshape(x, (x.shape[0], -1))
    assert out.shape == (2, 4 * 16 * 16), out.shape
    assert out.dtype == x.dtype
    assert jnp.array_equal(out, ref), "mismatch vs reference flatten"

    print("KERNEL_OK")
</pallas_src>

<mosaic_0001>
module attributes {stable_mosaic.version = 11 : i64} {
  func.func @_copy_kernel(%arg0: i32, %arg1: i32, %arg2: memref<2x1024xf32, #tpu.memory_space<vmem>>, %arg3: memref<2x1024xf32, #tpu.memory_space<vmem>>) attributes {dimension_semantics = [#tpu.dimension_semantics<parallel>, #tpu.dimension_semantics<parallel>], iteration_bounds = array<i64: 1, 1>, scalar_prefetch = 0 : i64, scratch_operands = 0 : i64, tpu.core_type = #tpu.core_type<tc>, window_params = [{transform_indices = @transform_0, window_bounds = array<i64: 2, 1024>}, {transform_indices = @transform_1, window_bounds = array<i64: 2, 1024>}]} {
    %c0 = arith.constant 0 : index
    %c0_0 = arith.constant 0 : index
    %0 = vector.load %arg2[%c0, %c0_0] : memref<2x1024xf32, #tpu.memory_space<vmem>>, vector<2x1024xf32>
    %c0_1 = arith.constant 0 : index
    %c0_2 = arith.constant 0 : index
    %1 = vector.load %arg3[%c0_1, %c0_2] : memref<2x1024xf32, #tpu.memory_space<vmem>>, vector<2x1024xf32>
    tpu.vector_store %arg3[%c0_1, %c0_2], %0 {strides = array<i32>} : memref<2x1024xf32, #tpu.memory_space<vmem>>, vector<2x1024xf32>,
    return
  }
  func.func @transform_0(%arg0: i32, %arg1: i32) -> (i32, i32) {
    %c0_i32 = arith.constant 0 : i32
    return %arg0, %arg1 : i32, i32
  }
  func.func @transform_1(%arg0: i32, %arg1: i32) -> (i32, i32) {
    %c0_i32 = arith.constant 0 : i32
    return %arg0, %arg1 : i32, i32
  }
}

</mosaic_0001>

<bundles_post_ra>
// kernel: flatten_forward.1
= control target key start
LH: loop header
LB: loop body
LE: loop exit
PB: predicated region body
PF: predicated region fallthrough
CT: control target
= control target key end

     0   :  { %s81_s0 = inlined_call_operand.vmem [shape: f32[2,1024], index: 0, kind: input, shape index: {}]   ;;  %s82_s1 = inlined_call_operand.hbm [shape: f32[2,1024], index: 1, kind: output, shape index: {}]  }
   0x1   :  { %v9_v0 = vld [vmem:[%s81_s0] sm:$0xff]  ;;  %v10_v1 = vld [vmem:[%s81_s0 + $0x8] sm:$0xff] }
   0x2   :  { %6 = vsyncpa [#allocation3], 0  ;;  %11 = vst [vmem:[#allocation2] sm:$0xff] %v9_v0  ;;  %s52_s10 = smov [#allocation2]  }
   0x3   :  { %12 = vst [vmem:[#allocation2 + $0x8] sm:$0xff] %v10_v1  ;;  %s19_s11 = sshll.u32 %s52_s10, 4  ;;  %s20_s11 = int_to_ptr.vmem [resolvable:$true] %s19_s11 }
   0x4   :  { %s28_s12 = scalar_lea.vmem %s20_s11, 256  ;;  %p33_p1 = scmp.lt.s32.totalorder %s20_s11, %s20_s11 }
   0x5   :  { %p29_p0 = scmp.ne.s32.totalorder %s20_s11, %s28_s12  ;;  %p34_p2 = scmp.lt.s32.totalorder %s28_s12, %s28_s12 }
   0x7   :  { %p35_p3 = por %p34_p2, %p33_p1 }
   0x9   :  { %p36_p4 = pnand %p35_p3, %p29_p0 }
   0xb   :  { %39 = shalt.err (!%p36_p4)
}
   0xc   :  { %s40_s15 = scalar_lea.hbm %s82_s1, 256 }
   0xd   :  { %p41_p5 = scmp.ne.s32.totalorder %s82_s1, %s40_s15  ;;  %p44_p6 = scmp.lt.u32.totalorder %s40_s15, %s82_s1 }
   0xf   :  { %p46_p7 = pnand %p44_p6, %p41_p5 }
  0x11   :  { %49 = shalt.err (!%p46_p7)
}
  0x12   :  { %22 = dma.vmem_to_hbm [thread:$0]  %s20_s11, 256, %s82_s1, [#allocation3]  }
  0x13   :  { %50 = dma.done.wait [#allocation3], 256  }
  0x14   :  { %51 = vsyncadd [#allocation3], 4294967040 }
  0x15   :  { %26 = vsyncpa [#allocation3], 1 }

</bundles_post_ra>
